<compile_context>
chip_gen: v5e
topology: v5e:2x2
jax: 0.10.0
libtpu: 0.0.40
codegen_flags: <defaults>
</compile_context>

<pallas_src>
import functools

import jax
import jax.numpy as jnp
from jax.experimental import pallas as pl
from jax.experimental.pallas import tpu as pltpu


# ---------------------------------------------------------------------------
# helpers
# ---------------------------------------------------------------------------
def _round_up(x, m):
    return ((x + m - 1) // m) * m


def _vocab_tiling(vocab):
    """Pick a lane-dense vocab tile TN and the padded vocab size (multiple of TN)."""
    vp = _round_up(vocab, 128)
    tn = min(vp, 2048)
    vp = _round_up(vp, tn)
    return tn, vp


# ---------------------------------------------------------------------------
# Kernel 1: embedding gather (DMA) + GRU (all layers, one step) + L1 + L2
# ---------------------------------------------------------------------------
def _gru_mlp_kernel(ids_ref, emb_hbm, hid_ref, wi_ref, wh_ref, bi_ref, bh_ref,
                    w1_ref, b1_ref, w2_ref, b2_ref,
                    o_ref, new_hid_ref,
                    emb_vmem, dma_sems, *,
                    n_layers, hid_dim, in_max, batch_pad):
    H = hid_dim

    # --- embedding gather: B row DMAs HBM -> VMEM scratch --------------------
    for b in range(batch_pad):
        idx = ids_ref[b]
        pltpu.make_async_copy(emb_hbm.at[pl.ds(idx, 1), :],
                              emb_vmem.at[pl.ds(b, 1), :],
                              dma_sems.at[b]).start()
    for b in range(batch_pad):
        pltpu.make_async_copy(emb_hbm.at[pl.ds(0, 1), :],
                              emb_vmem.at[pl.ds(b, 1), :],
                              dma_sems.at[b]).wait()

    x = emb_vmem[...]                                        # [B, in_max] f32
    h_new = None

    for l in range(n_layers):
        h = hid_ref[l]                                       # [B, H] f32

        # fused gate matmuls: 2 wide dots per layer, f32 accumulation on MXU.
        # wi is the full [in_max, 3H] weight (padded rows are zero) -> no
        # in-kernel slice copy; x is padded to in_max columns to match.
        gi = jnp.dot(x.astype(jnp.bfloat16), wi_ref[l],
                     preferred_element_type=jnp.float32) + bi_ref[l]   # [B, 3H]
        gh = jnp.dot(h.astype(jnp.bfloat16), wh_ref[l],
                     preferred_element_type=jnp.float32) + bh_ref[l]   # [B, 3H]

        r = jax.nn.sigmoid(gi[:, :H] + gh[:, :H])
        z = jax.nn.sigmoid(gi[:, H:2 * H] + gh[:, H:2 * H])
        n = jnp.tanh(gi[:, 2 * H:] + r * gh[:, 2 * H:])      # b_hn inside r* term (PyTorch)
        h_new = (1.0 - z) * n + z * h                        # [B, H]

        new_hid_ref[l] = h_new
        if l + 1 < n_layers:
            if in_max > H:   # only when emb_dim > hid_dim; zero cols hit zero wi rows
                x = jnp.pad(h_new, ((0, 0), (0, in_max - H)))
            else:
                x = h_new

    # embedding2vocab1/2 : H -> 2H -> 4H
    o = jnp.dot(h_new.astype(jnp.bfloat16), w1_ref[...],
                preferred_element_type=jnp.float32) + b1_ref[...]
    o = jnp.dot(o.astype(jnp.bfloat16), w2_ref[...],
                preferred_element_type=jnp.float32) + b2_ref[...]
    o_ref[...] = o.astype(jnp.bfloat16)                      # bf16 feed for kernel 2


# ---------------------------------------------------------------------------
# Kernel 2: embedding2vocab3, int8 weight streamed over the vocab dimension
# ---------------------------------------------------------------------------
def _vocab_proj_kernel(o_ref, w3_ref, s3_ref, b3_ref, pred_ref, *, tn):
    start = pl.multiple_of(pl.program_id(0) * tn, 128)
    # int8 -> bf16 is exact for |q| <= 127; scale applied on the f32 accumulator.
    w = w3_ref[...].astype(jnp.float32).astype(jnp.bfloat16)          # [4H, TN]
    acc = jnp.dot(o_ref[...], w, preferred_element_type=jnp.float32)  # [B, TN] f32
    scale = s3_ref[:, pl.ds(start, tn)]                               # resident bias/scale
    bias = b3_ref[:, pl.ds(start, tn)]
    pred_ref[...] = acc * scale + bias


# ---------------------------------------------------------------------------
# Wrapper
# ---------------------------------------------------------------------------
def decoder_forward(input_ids, hidden, encoder_outputs, params, *,
                    n_layers, emb_dim, hid_dim, vocab_size):
    """input_ids: [B] int; hidden: [n_layers, B, H]; encoder_outputs unused (isatt=False)."""
    del encoder_outputs  # isatt = False -> attention branch skipped
    B = input_ids.shape[0]
    H = hid_dim
    H4 = 4 * H
    in_max = max(emb_dim, H)
    B_pad = _round_up(B, 8)   # fill f32 sublanes; batch rows are nearly free (weight-BW bound)

    ids = input_ids.astype(jnp.int32)
    hidden_f = hidden.astype(jnp.float32)
    if B_pad != B:
        ids = jnp.pad(ids, (0, B_pad - B))                  # padded rows gather row 0, discarded
        hidden_f = jnp.pad(hidden_f, ((0, 0), (0, B_pad - B), (0, 0)))

    # ---- call 1: embedding gather + GRU + L1 + L2 (weights resident in VMEM) --
    kernel1 = functools.partial(_gru_mlp_kernel, n_layers=n_layers, hid_dim=H,
                                in_max=in_max, batch_pad=B_pad)
    o4, new_hidden_p = pl.pallas_call(
        kernel1,
        out_shape=(jax.ShapeDtypeStruct((B_pad, H4), jnp.bfloat16),
                   jax.ShapeDtypeStruct((n_layers, B_pad, H), jnp.float32)),
        in_specs=[
            pl.BlockSpec(memory_space=pltpu.MemorySpace.SMEM),   # ids
            pl.BlockSpec(memory_space=pl.ANY),                   # embedding table (HBM)
            pl.BlockSpec(memory_space=pltpu.MemorySpace.VMEM),   # hidden
            pl.BlockSpec(memory_space=pltpu.MemorySpace.VMEM),   # wi
            pl.BlockSpec(memory_space=pltpu.MemorySpace.VMEM),   # wh
            pl.BlockSpec(memory_space=pltpu.MemorySpace.VMEM),   # bi
            pl.BlockSpec(memory_space=pltpu.MemorySpace.VMEM),   # bh
            pl.BlockSpec(memory_space=pltpu.MemorySpace.VMEM),   # w1
            pl.BlockSpec(memory_space=pltpu.MemorySpace.VMEM),   # b1
            pl.BlockSpec(memory_space=pltpu.MemorySpace.VMEM),   # w2
            pl.BlockSpec(memory_space=pltpu.MemorySpace.VMEM),   # b2
        ],
        out_specs=(pl.BlockSpec(memory_space=pltpu.MemorySpace.VMEM),
                   pl.BlockSpec(memory_space=pltpu.MemorySpace.VMEM)),
        scratch_shapes=[pltpu.VMEM((B_pad, in_max), jnp.float32),
                        pltpu.SemaphoreType.DMA((B_pad,))],
        compiler_params=pltpu.CompilerParams(vmem_limit_bytes=32 * 1024 * 1024),
    )(ids, params["embedding"], hidden_f,
      params["wi"], params["wh"], params["bi"], params["bh"],
      params["w1"], params["b1"], params["w2"], params["b2"])

    # ---- call 2: vocab projection, int8 weight streamed over vocab tiles ------
    # Kept as a separate call so the vocab axis stays "parallel" (v7x 2-TC sharding).
    TN, vocab_p = _vocab_tiling(vocab_size)
    n_tiles = vocab_p // TN
    kernel2 = functools.partial(_vocab_proj_kernel, tn=TN)
    pred_p = pl.pallas_call(
        kernel2,
        out_shape=jax.ShapeDtypeStruct((B_pad, vocab_p), jnp.float32),
        grid=(n_tiles,),
        in_specs=[pl.BlockSpec((B_pad, H4), lambda j: (0, 0)),    # o4 resident (bf16)
                  pl.BlockSpec((H4, TN), lambda j: (0, j)),       # streamed int8 weight tile
                  pl.BlockSpec((1, vocab_p), lambda j: (0, 0)),   # scales resident
                  pl.BlockSpec((1, vocab_p), lambda j: (0, 0))],  # bias resident
        out_specs=pl.BlockSpec((B_pad, TN), lambda j: (0, j)),
        compiler_params=pltpu.CompilerParams(
            dimension_semantics=("parallel",),
            vmem_limit_bytes=32 * 1024 * 1024),
    )(o4, params["w3q"], params["s3"], params["b3"])

    pred = pred_p[:B, :vocab_size]
    new_hidden = new_hidden_p[:, :B, :]
    return pred, new_hidden


# ---------------------------------------------------------------------------
# Deterministic parameter init (synthetic; shapes follow Decoder.__init__)
# Weights stored [in, out] (transposed vs PyTorch), GRU gates packed (r|z|n),
# GRU/L1/L2 weights bf16, biases f32; w3 int8 + per-column f32 scales, both
# zero-/one-padded to the vocab tile multiple.  The embedding table is
# column-padded to in_max so layer 0 dots against the full stacked wi.
# ---------------------------------------------------------------------------
def init_params(key, vocab_size, emb_dim, hid_dim, n_layers):
    scale = 0.1
    H = hid_dim
    in_max = max(emb_dim, H)
    keys = iter(jax.random.split(key, 12 + 4 * n_layers))

    def w(shape):
        return (scale * jax.random.normal(next(keys), shape)).astype(jnp.float32)

    params = {}
    emb = w((vocab_size, emb_dim))
    params["embedding"] = jnp.pad(emb, ((0, 0), (0, in_max - emb_dim)))

    wi = jnp.zeros((n_layers, in_max, 3 * H), jnp.float32)
    wh = jnp.zeros((n_layers, H, 3 * H), jnp.float32)
    bi = jnp.zeros((n_layers, 1, 3 * H), jnp.float32)
    bh = jnp.zeros((n_layers, 1, 3 * H), jnp.float32)
    for l in range(n_layers):
        in_dim = emb_dim if l == 0 else H
        wi = wi.at[l, :in_dim, :].set(w((in_dim, 3 * H)))
        wh = wh.at[l].set(w((H, 3 * H)))
        bi = bi.at[l].set(w((1, 3 * H)))
        bh = bh.at[l].set(w((1, 3 * H)))
    params["wi"] = wi.astype(jnp.bfloat16)
    params["wh"] = wh.astype(jnp.bfloat16)
    params["bi"] = bi
    params["bh"] = bh

    params["w1"] = w((H, 2 * H)).astype(jnp.bfloat16)
    params["b1"] = w((1, 2 * H))
    params["w2"] = w((2 * H, 4 * H)).astype(jnp.bfloat16)
    params["b2"] = w((1, 4 * H))

    # classifier weight: per-output-column symmetric int8 quantization
    _, vocab_p = _vocab_tiling(vocab_size)
    pad = vocab_p - vocab_size
    w3 = w((4 * H, vocab_size))
    b3 = w((1, vocab_size))
    absmax = jnp.max(jnp.abs(w3), axis=0, keepdims=True)          # [1, vocab]
    s3 = jnp.where(absmax > 0, absmax / 127.0, jnp.float32(1.0))
    w3q = jnp.clip(jnp.round(w3 / s3), -127, 127).astype(jnp.int8)
    params["w3q"] = jnp.pad(w3q, ((0, 0), (0, pad)))
    params["s3"] = jnp.pad(s3, ((0, 0), (0, pad)), constant_values=1.0)
    params["b3"] = jnp.pad(b3, ((0, 0), (0, pad)))
    return params


# ---------------------------------------------------------------------------
# Pure-JAX reference (same bf16 / int8-dequantized weights, f32 math)
# ---------------------------------------------------------------------------
def _reference(input_ids, hidden, params, *, n_layers, emb_dim, hid_dim, vocab_size):
    H = hid_dim
    in_max = max(emb_dim, H)
    x = jnp.take(params["embedding"], input_ids, axis=0).astype(jnp.float32)  # [B, in_max]
    hs = []
    for l in range(n_layers):
        wi = params["wi"][l].astype(jnp.float32)    # [in_max, 3H]
        wh = params["wh"][l].astype(jnp.float32)
        gi = x @ wi + params["bi"][l]
        gh = hidden[l] @ wh + params["bh"][l]
        r = jax.nn.sigmoid(gi[:, :H] + gh[:, :H])
        z = jax.nn.sigmoid(gi[:, H:2 * H] + gh[:, H:2 * H])
        n = jnp.tanh(gi[:, 2 * H:] + r * gh[:, 2 * H:])
        h_new = (1.0 - z) * n + z * hidden[l]
        hs.append(h_new)
        x = jnp.pad(h_new, ((0, 0), (0, in_max - H))) if in_max > H else h_new
    o = hs[-1] @ params["w1"].astype(jnp.float32) + params["b1"]
    o = o @ params["w2"].astype(jnp.float32) + params["b2"]
    w3 = params["w3q"].astype(jnp.float32) * params["s3"]          # dequantized
    pred = o @ w3 + params["b3"]
    return pred[:, :vocab_size], jnp.stack(hs)


# ---------------------------------------------------------------------------
if __name__ == "__main__":
    # small, forward-consistent shapes
    VOCAB = 128
    EMB = 32
    HID = 32
    N_LAYERS = 2
    BATCH = 4
    SRC_LEN = 8

    key = jax.random.PRNGKey(0)
    k_params, k_ids, k_hid, k_enc = jax.random.split(key, 4)

    params = init_params(k_params, VOCAB, EMB, HID, N_LAYERS)

    input_ids = jax.random.randint(k_ids, (BATCH,), 0, VOCAB, dtype=jnp.int32)
    hidden = (0.1 * jax.random.normal(k_hid, (N_LAYERS, BATCH, HID))).astype(jnp.float32)
    # encoder outputs (unused with isatt=False): [B, src_len, 2*hid_dim]
    encoder_outputs = (0.1 * jax.random.normal(k_enc, (BATCH, SRC_LEN, 2 * HID))).astype(jnp.float32)

    pred, new_hidden = decoder_forward(
        input_ids, hidden, encoder_outputs, params,
        n_layers=N_LAYERS, emb_dim=EMB, hid_dim=HID, vocab_size=VOCAB)
    jax.block_until_ready((pred, new_hidden))

    assert pred.shape == (BATCH, VOCAB)
    assert new_hidden.shape == (N_LAYERS, BATCH, HID)

    # correctness check against a pure-JAX reference using the same quantized
    # weights (remaining delta = bf16 activation rounding in the matmuls)
    ref_pred, ref_hidden = _reference(
        input_ids, hidden, params,
        n_layers=N_LAYERS, emb_dim=EMB, hid_dim=HID, vocab_size=VOCAB)
    assert jnp.allclose(pred, ref_pred, atol=2e-2, rtol=2e-2)
    assert jnp.allclose(new_hidden, ref_hidden, atol=2e-2, rtol=2e-2)

    print("KERNEL_OK")
</pallas_src>

<mosaic_0001>
module attributes {stable_mosaic.version = 11 : i64} {
  func.func @_gru_mlp_kernel(%arg0: memref<8xi32, #tpu.memory_space<smem>>, %arg1: memref<128x32xf32, #tpu.memory_space<any>>, %arg2: memref<2x8x32xf32, #tpu.memory_space<vmem>>, %arg3: memref<2x32x96xbf16, #tpu.memory_space<vmem>>, %arg4: memref<2x32x96xbf16, #tpu.memory_space<vmem>>, %arg5: memref<2x1x96xf32, #tpu.memory_space<vmem>>, %arg6: memref<2x1x96xf32, #tpu.memory_space<vmem>>, %arg7: memref<32x64xbf16, #tpu.memory_space<vmem>>, %arg8: memref<1x64xf32, #tpu.memory_space<vmem>>, %arg9: memref<64x128xbf16, #tpu.memory_space<vmem>>, %arg10: memref<1x128xf32, #tpu.memory_space<vmem>>, %arg11: memref<8x128xbf16, #tpu.memory_space<vmem>>, %arg12: memref<2x8x32xf32, #tpu.memory_space<vmem>>, %arg13: memref<8x32xf32, #tpu.memory_space<vmem>>, %arg14: memref<8x!tpu.dma_semaphore, #tpu.memory_space<semaphore_mem>>) attributes {dimension_semantics = [], scalar_prefetch = 0 : i64, scratch_operands = 2 : i64, tpu.core_type = #tpu.core_type<tc>} {
    %c0 = arith.constant 0 : index
    %0 = memref.load %arg0[%c0] : memref<8xi32, #tpu.memory_space<smem>>
    %c0_i32 = arith.constant 0 : i32
    %c0_i32_0 = arith.constant 0 : i32
    %1 = tpu.memref_slice %arg1[%0, %c0_i32_0] : memref<128x32xf32, #tpu.memory_space<any>> -> memref<1x32xf32, #tpu.memory_space<any>>
    %c0_i32_1 = arith.constant 0 : i32
    %c0_i32_2 = arith.constant 0 : i32
    %2 = tpu.memref_slice %arg13[%c0_i32_1, %c0_i32_2] : memref<8x32xf32, #tpu.memory_space<vmem>> -> memref<1x32xf32, #tpu.memory_space<vmem>>
    %3 = tpu.memref_slice %arg14[%c0_i32] : memref<8x!tpu.dma_semaphore, #tpu.memory_space<semaphore_mem>> -> memref<1x!tpu.dma_semaphore, #tpu.memory_space<semaphore_mem>>
    %4 = tpu.memref_squeeze %3 : memref<1x!tpu.dma_semaphore, #tpu.memory_space<semaphore_mem>> -> memref<!tpu.dma_semaphore, #tpu.memory_space<semaphore_mem>>
    tpu.enqueue_dma source(%1 : memref<1x32xf32, #tpu.memory_space<any>>) target(%2 : memref<1x32xf32, #tpu.memory_space<vmem>>) target_semaphore(%4 : memref<!tpu.dma_semaphore, #tpu.memory_space<semaphore_mem>>)
    %c1 = arith.constant 1 : index
    %5 = memref.load %arg0[%c1] : memref<8xi32, #tpu.memory_space<smem>>
    %c1_i32 = arith.constant 1 : i32
    %c0_i32_3 = arith.constant 0 : i32
    %6 = tpu.memref_slice %arg1[%5, %c0_i32_3] : memref<128x32xf32, #tpu.memory_space<any>> -> memref<1x32xf32, #tpu.memory_space<any>>
    %c1_i32_4 = arith.constant 1 : i32
    %c0_i32_5 = arith.constant 0 : i32
    %7 = tpu.memref_slice %arg13[%c1_i32_4, %c0_i32_5] : memref<8x32xf32, #tpu.memory_space<vmem>> -> memref<1x32xf32, #tpu.memory_space<vmem>>
    %8 = tpu.memref_slice %arg14[%c1_i32] : memref<8x!tpu.dma_semaphore, #tpu.memory_space<semaphore_mem>> -> memref<1x!tpu.dma_semaphore, #tpu.memory_space<semaphore_mem>>
    %9 = tpu.memref_squeeze %8 : memref<1x!tpu.dma_semaphore, #tpu.memory_space<semaphore_mem>> -> memref<!tpu.dma_semaphore, #tpu.memory_space<semaphore_mem>>
    tpu.enqueue_dma source(%6 : memref<1x32xf32, #tpu.memory_space<any>>) target(%7 : memref<1x32xf32, #tpu.memory_space<vmem>>) target_semaphore(%9 : memref<!tpu.dma_semaphore, #tpu.memory_space<semaphore_mem>>)
    %c2 = arith.constant 2 : index
    %10 = memref.load %arg0[%c2] : memref<8xi32, #tpu.memory_space<smem>>
    %c2_i32 = arith.constant 2 : i32
    %c0_i32_6 = arith.constant 0 : i32
    %11 = tpu.memref_slice %arg1[%10, %c0_i32_6] : memref<128x32xf32, #tpu.memory_space<any>> -> memref<1x32xf32, #tpu.memory_space<any>>
    %c2_i32_7 = arith.constant 2 : i32
    %c0_i32_8 = arith.constant 0 : i32
    %12 = tpu.memref_slice %arg13[%c2_i32_7, %c0_i32_8] : memref<8x32xf32, #tpu.memory_space<vmem>> -> memref<1x32xf32, #tpu.memory_space<vmem>>
    %13 = tpu.memref_slice %arg14[%c2_i32] : memref<8x!tpu.dma_semaphore, #tpu.memory_space<semaphore_mem>> -> memref<1x!tpu.dma_semaphore, #tpu.memory_space<semaphore_mem>>
    %14 = tpu.memref_squeeze %13 : memref<1x!tpu.dma_semaphore, #tpu.memory_space<semaphore_mem>> -> memref<!tpu.dma_semaphore, #tpu.memory_space<semaphore_mem>>
    tpu.enqueue_dma source(%11 : memref<1x32xf32, #tpu.memory_space<any>>) target(%12 : memref<1x32xf32, #tpu.memory_space<vmem>>) target_semaphore(%14 : memref<!tpu.dma_semaphore, #tpu.memory_space<semaphore_mem>>)
    %c3 = arith.constant 3 : index
    %15 = memref.load %arg0[%c3] : memref<8xi32, #tpu.memory_space<smem>>
    %c3_i32 = arith.constant 3 : i32
    %c0_i32_9 = arith.constant 0 : i32
    %16 = tpu.memref_slice %arg1[%15, %c0_i32_9] : memref<128x32xf32, #tpu.memory_space<any>> -> memref<1x32xf32, #tpu.memory_space<any>>
    %c3_i32_10 = arith.constant 3 : i32
    %c0_i32_11 = arith.constant 0 : i32
    %17 = tpu.memref_slice %arg13[%c3_i32_10, %c0_i32_11] : memref<8x32xf32, #tpu.memory_space<vmem>> -> memref<1x32xf32, #tpu.memory_space<vmem>>
    %18 = tpu.memref_slice %arg14[%c3_i32] : memref<8x!tpu.dma_semaphore, #tpu.memory_space<semaphore_mem>> -> memref<1x!tpu.dma_semaphore, #tpu.memory_space<semaphore_mem>>
    %19 = tpu.memref_squeeze %18 : memref<1x!tpu.dma_semaphore, #tpu.memory_space<semaphore_mem>> -> memref<!tpu.dma_semaphore, #tpu.memory_space<semaphore_mem>>
    tpu.enqueue_dma source(%16 : memref<1x32xf32, #tpu.memory_space<any>>) target(%17 : memref<1x32xf32, #tpu.memory_space<vmem>>) target_semaphore(%19 : memref<!tpu.dma_semaphore, #tpu.memory_space<semaphore_mem>>)
    %c4 = arith.constant 4 : index
    %20 = memref.load %arg0[%c4] : memref<8xi32, #tpu.memory_space<smem>>
    %c4_i32 = arith.constant 4 : i32
    %c0_i32_12 = arith.constant 0 : i32
    %21 = tpu.memref_slice %arg1[%20, %c0_i32_12] : memref<128x32xf32, #tpu.memory_space<any>> -> memref<1x32xf32, #tpu.memory_space<any>>
    %c4_i32_13 = arith.constant 4 : i32
    %c0_i32_14 = arith.constant 0 : i32
    %22 = tpu.memref_slice %arg13[%c4_i32_13, %c0_i32_14] : memref<8x32xf32, #tpu.memory_space<vmem>> -> memref<1x32xf32, #tpu.memory_space<vmem>>
    %23 = tpu.memref_slice %arg14[%c4_i32] : memref<8x!tpu.dma_semaphore, #tpu.memory_space<semaphore_mem>> -> memref<1x!tpu.dma_semaphore, #tpu.memory_space<semaphore_mem>>
    %24 = tpu.memref_squeeze %23 : memref<1x!tpu.dma_semaphore, #tpu.memory_space<semaphore_mem>> -> memref<!tpu.dma_semaphore, #tpu.memory_space<semaphore_mem>>
    tpu.enqueue_dma source(%21 : memref<1x32xf32, #tpu.memory_space<any>>) target(%22 : memref<1x32xf32, #tpu.memory_space<vmem>>) target_semaphore(%24 : memref<!tpu.dma_semaphore, #tpu.memory_space<semaphore_mem>>)
    %c5 = arith.constant 5 : index
    %25 = memref.load %arg0[%c5] : memref<8xi32, #tpu.memory_space<smem>>
    %c5_i32 = arith.constant 5 : i32
    %c0_i32_15 = arith.constant 0 : i32
    %26 = tpu.memref_slice %arg1[%25, %c0_i32_15] : memref<128x32xf32, #tpu.memory_space<any>> -> memref<1x32xf32, #tpu.memory_space<any>>
    %c5_i32_16 = arith.constant 5 : i32
    %c0_i32_17 = arith.constant 0 : i32
    %27 = tpu.memref_slice %arg13[%c5_i32_16, %c0_i32_17] : memref<8x32xf32, #tpu.memory_space<vmem>> -> memref<1x32xf32, #tpu.memory_space<vmem>>
    %28 = tpu.memref_slice %arg14[%c5_i32] : memref<8x!tpu.dma_semaphore, #tpu.memory_space<semaphore_mem>> -> memref<1x!tpu.dma_semaphore, #tpu.memory_space<semaphore_mem>>
    %29 = tpu.memref_squeeze %28 : memref<1x!tpu.dma_semaphore, #tpu.memory_space<semaphore_mem>> -> memref<!tpu.dma_semaphore, #tpu.memory_space<semaphore_mem>>
    tpu.enqueue_dma source(%26 : memref<1x32xf32, #tpu.memory_space<any>>) target(%27 : memref<1x32xf32, #tpu.memory_space<vmem>>) target_semaphore(%29 : memref<!tpu.dma_semaphore, #tpu.memory_space<semaphore_mem>>)
    %c6 = arith.constant 6 : index
    %30 = memref.load %arg0[%c6] : memref<8xi32, #tpu.memory_space<smem>>
    %c6_i32 = arith.constant 6 : i32
    %c0_i32_18 = arith.constant 0 : i32
    %31 = tpu.memref_slice %arg1[%30, %c0_i32_18] : memref<128x32xf32, #tpu.memory_space<any>> -> memref<1x32xf32, #tpu.memory_space<any>>
    %c6_i32_19 = arith.constant 6 : i32
    %c0_i32_20 = arith.constant 0 : i32
    %32 = tpu.memref_slice %arg13[%c6_i32_19, %c0_i32_20] : memref<8x32xf32, #tpu.memory_space<vmem>> -> memref<1x32xf32, #tpu.memory_space<vmem>>
    %33 = tpu.memref_slice %arg14[%c6_i32] : memref<8x!tpu.dma_semaphore, #tpu.memory_space<semaphore_mem>> -> memref<1x!tpu.dma_semaphore, #tpu.memory_space<semaphore_mem>>
    %34 = tpu.memref_squeeze %33 : memref<1x!tpu.dma_semaphore, #tpu.memory_space<semaphore_mem>> -> memref<!tpu.dma_semaphore, #tpu.memory_space<semaphore_mem>>
    tpu.enqueue_dma source(%31 : memref<1x32xf32, #tpu.memory_space<any>>) target(%32 : memref<1x32xf32, #tpu.memory_space<vmem>>) target_semaphore(%34 : memref<!tpu.dma_semaphore, #tpu.memory_space<semaphore_mem>>)
    %c7 = arith.constant 7 : index
    %35 = memref.load %arg0[%c7] : memref<8xi32, #tpu.memory_space<smem>>
    %c7_i32 = arith.constant 7 : i32
    %c0_i32_21 = arith.constant 0 : i32
    %36 = tpu.memref_slice %arg1[%35, %c0_i32_21] : memref<128x32xf32, #tpu.memory_space<any>> -> memref<1x32xf32, #tpu.memory_space<any>>
    %c7_i32_22 = arith.constant 7 : i32
    %c0_i32_23 = arith.constant 0 : i32
    %37 = tpu.memref_slice %arg13[%c7_i32_22, %c0_i32_23] : memref<8x32xf32, #tpu.memory_space<vmem>> -> memref<1x32xf32, #tpu.memory_space<vmem>>
    %38 = tpu.memref_slice %arg14[%c7_i32] : memref<8x!tpu.dma_semaphore, #tpu.memory_space<semaphore_mem>> -> memref<1x!tpu.dma_semaphore, #tpu.memory_space<semaphore_mem>>
    %39 = tpu.memref_squeeze %38 : memref<1x!tpu.dma_semaphore, #tpu.memory_space<semaphore_mem>> -> memref<!tpu.dma_semaphore, #tpu.memory_space<semaphore_mem>>
    tpu.enqueue_dma source(%36 : memref<1x32xf32, #tpu.memory_space<any>>) target(%37 : memref<1x32xf32, #tpu.memory_space<vmem>>) target_semaphore(%39 : memref<!tpu.dma_semaphore, #tpu.memory_space<semaphore_mem>>)
    %c0_i32_24 = arith.constant 0 : i32
    %c0_i32_25 = arith.constant 0 : i32
    %c0_i32_26 = arith.constant 0 : i32
    %40 = tpu.memref_slice %arg1[%c0_i32_25, %c0_i32_26] : memref<128x32xf32, #tpu.memory_space<any>> -> memref<1x32xf32, #tpu.memory_space<any>>
    %c0_i32_27 = arith.constant 0 : i32
    %c0_i32_28 = arith.constant 0 : i32
    %41 = tpu.memref_slice %arg13[%c0_i32_27, %c0_i32_28] : memref<8x32xf32, #tpu.memory_space<vmem>> -> memref<1x32xf32, #tpu.memory_space<vmem>>
    %42 = tpu.memref_slice %arg14[%c0_i32_24] : memref<8x!tpu.dma_semaphore, #tpu.memory_space<semaphore_mem>> -> memref<1x!tpu.dma_semaphore, #tpu.memory_space<semaphore_mem>>
    %43 = tpu.memref_squeeze %42 : memref<1x!tpu.dma_semaphore, #tpu.memory_space<semaphore_mem>> -> memref<!tpu.dma_semaphore, #tpu.memory_space<semaphore_mem>>
    tpu.wait_dma2 semaphore(%43 : memref<!tpu.dma_semaphore, #tpu.memory_space<semaphore_mem>>) src(%40 : memref<1x32xf32, #tpu.memory_space<any>>) dst(%41 : memref<1x32xf32, #tpu.memory_space<vmem>>)
    %c1_i32_29 = arith.constant 1 : i32
    %c0_i32_30 = arith.constant 0 : i32
    %c0_i32_31 = arith.constant 0 : i32
    %44 = tpu.memref_slice %arg1[%c0_i32_30, %c0_i32_31] : memref<128x32xf32, #tpu.memory_space<any>> -> memref<1x32xf32, #tpu.memory_space<any>>
    %c1_i32_32 = arith.constant 1 : i32
    %c0_i32_33 = arith.constant 0 : i32
    %45 = tpu.memref_slice %arg13[%c1_i32_32, %c0_i32_33] : memref<8x32xf32, #tpu.memory_space<vmem>> -> memref<1x32xf32, #tpu.memory_space<vmem>>
    %46 = tpu.memref_slice %arg14[%c1_i32_29] : memref<8x!tpu.dma_semaphore, #tpu.memory_space<semaphore_mem>> -> memref<1x!tpu.dma_semaphore, #tpu.memory_space<semaphore_mem>>
    %47 = tpu.memref_squeeze %46 : memref<1x!tpu.dma_semaphore, #tpu.memory_space<semaphore_mem>> -> memref<!tpu.dma_semaphore, #tpu.memory_space<semaphore_mem>>
    tpu.wait_dma2 semaphore(%47 : memref<!tpu.dma_semaphore, #tpu.memory_space<semaphore_mem>>) src(%44 : memref<1x32xf32, #tpu.memory_space<any>>) dst(%45 : memref<1x32xf32, #tpu.memory_space<vmem>>)
    %c2_i32_34 = arith.constant 2 : i32
    %c0_i32_35 = arith.constant 0 : i32
    %c0_i32_36 = arith.constant 0 : i32
    %48 = tpu.memref_slice %arg1[%c0_i32_35, %c0_i32_36] : memref<128x32xf32, #tpu.memory_space<any>> -> memref<1x32xf32, #tpu.memory_space<any>>
    %c2_i32_37 = arith.constant 2 : i32
    %c0_i32_38 = arith.constant 0 : i32
    %49 = tpu.memref_slice %arg13[%c2_i32_37, %c0_i32_38] : memref<8x32xf32, #tpu.memory_space<vmem>> -> memref<1x32xf32, #tpu.memory_space<vmem>>
    %50 = tpu.memref_slice %arg14[%c2_i32_34] : memref<8x!tpu.dma_semaphore, #tpu.memory_space<semaphore_mem>> -> memref<1x!tpu.dma_semaphore, #tpu.memory_space<semaphore_mem>>
    %51 = tpu.memref_squeeze %50 : memref<1x!tpu.dma_semaphore, #tpu.memory_space<semaphore_mem>> -> memref<!tpu.dma_semaphore, #tpu.memory_space<semaphore_mem>>
    tpu.wait_dma2 semaphore(%51 : memref<!tpu.dma_semaphore, #tpu.memory_space<semaphore_mem>>) src(%48 : memref<1x32xf32, #tpu.memory_space<any>>) dst(%49 : memref<1x32xf32, #tpu.memory_space<vmem>>)
    %c3_i32_39 = arith.constant 3 : i32
    %c0_i32_40 = arith.constant 0 : i32
    %c0_i32_41 = arith.constant 0 : i32
    %52 = tpu.memref_slice %arg1[%c0_i32_40, %c0_i32_41] : memref<128x32xf32, #tpu.memory_space<any>> -> memref<1x32xf32, #tpu.memory_space<any>>
    %c3_i32_42 = arith.constant 3 : i32
    %c0_i32_43 = arith.constant 0 : i32
    %53 = tpu.memref_slice %arg13[%c3_i32_42, %c0_i32_43] : memref<8x32xf32, #tpu.memory_space<vmem>> -> memref<1x32xf32, #tpu.memory_space<vmem>>
    %54 = tpu.memref_slice %arg14[%c3_i32_39] : memref<8x!tpu.dma_semaphore, #tpu.memory_space<semaphore_mem>> -> memref<1x!tpu.dma_semaphore, #tpu.memory_space<semaphore_mem>>
    %55 = tpu.memref_squeeze %54 : memref<1x!tpu.dma_semaphore, #tpu.memory_space<semaphore_mem>> -> memref<!tpu.dma_semaphore, #tpu.memory_space<semaphore_mem>>
    tpu.wait_dma2 semaphore(%55 : memref<!tpu.dma_semaphore, #tpu.memory_space<semaphore_mem>>) src(%52 : memref<1x32xf32, #tpu.memory_space<any>>) dst(%53 : memref<1x32xf32, #tpu.memory_space<vmem>>)
    %c4_i32_44 = arith.constant 4 : i32
    %c0_i32_45 = arith.constant 0 : i32
    %c0_i32_46 = arith.constant 0 : i32
    %56 = tpu.memref_slice %arg1[%c0_i32_45, %c0_i32_46] : memref<128x32xf32, #tpu.memory_space<any>> -> memref<1x32xf32, #tpu.memory_space<any>>
    %c4_i32_47 = arith.constant 4 : i32
    %c0_i32_48 = arith.constant 0 : i32
    %57 = tpu.memref_slice %arg13[%c4_i32_47, %c0_i32_48] : memref<8x32xf32, #tpu.memory_space<vmem>> -> memref<1x32xf32, #tpu.memory_space<vmem>>
    %58 = tpu.memref_slice %arg14[%c4_i32_44] : memref<8x!tpu.dma_semaphore, #tpu.memory_space<semaphore_mem>> -> memref<1x!tpu.dma_semaphore, #tpu.memory_space<semaphore_mem>>
    %59 = tpu.memref_squeeze %58 : memref<1x!tpu.dma_semaphore, #tpu.memory_space<semaphore_mem>> -> memref<!tpu.dma_semaphore, #tpu.memory_space<semaphore_mem>>
    tpu.wait_dma2 semaphore(%59 : memref<!tpu.dma_semaphore, #tpu.memory_space<semaphore_mem>>) src(%56 : memref<1x32xf32, #tpu.memory_space<any>>) dst(%57 : memref<1x32xf32, #tpu.memory_space<vmem>>)
    %c5_i32_49 = arith.constant 5 : i32
    %c0_i32_50 = arith.constant 0 : i32
    %c0_i32_51 = arith.constant 0 : i32
    %60 = tpu.memref_slice %arg1[%c0_i32_50, %c0_i32_51] : memref<128x32xf32, #tpu.memory_space<any>> -> memref<1x32xf32, #tpu.memory_space<any>>
    %c5_i32_52 = arith.constant 5 : i32
    %c0_i32_53 = arith.constant 0 : i32
    %61 = tpu.memref_slice %arg13[%c5_i32_52, %c0_i32_53] : memref<8x32xf32, #tpu.memory_space<vmem>> -> memref<1x32xf32, #tpu.memory_space<vmem>>
    %62 = tpu.memref_slice %arg14[%c5_i32_49] : memref<8x!tpu.dma_semaphore, #tpu.memory_space<semaphore_mem>> -> memref<1x!tpu.dma_semaphore, #tpu.memory_space<semaphore_mem>>
    %63 = tpu.memref_squeeze %62 : memref<1x!tpu.dma_semaphore, #tpu.memory_space<semaphore_mem>> -> memref<!tpu.dma_semaphore, #tpu.memory_space<semaphore_mem>>
    tpu.wait_dma2 semaphore(%63 : memref<!tpu.dma_semaphore, #tpu.memory_space<semaphore_mem>>) src(%60 : memref<1x32xf32, #tpu.memory_space<any>>) dst(%61 : memref<1x32xf32, #tpu.memory_space<vmem>>)
    %c6_i32_54 = arith.constant 6 : i32
    %c0_i32_55 = arith.constant 0 : i32
    %c0_i32_56 = arith.constant 0 : i32
    %64 = tpu.memref_slice %arg1[%c0_i32_55, %c0_i32_56] : memref<128x32xf32, #tpu.memory_space<any>> -> memref<1x32xf32, #tpu.memory_space<any>>
    %c6_i32_57 = arith.constant 6 : i32
    %c0_i32_58 = arith.constant 0 : i32
    %65 = tpu.memref_slice %arg13[%c6_i32_57, %c0_i32_58] : memref<8x32xf32, #tpu.memory_space<vmem>> -> memref<1x32xf32, #tpu.memory_space<vmem>>
    %66 = tpu.memref_slice %arg14[%c6_i32_54] : memref<8x!tpu.dma_semaphore, #tpu.memory_space<semaphore_mem>> -> memref<1x!tpu.dma_semaphore, #tpu.memory_space<semaphore_mem>>
    %67 = tpu.memref_squeeze %66 : memref<1x!tpu.dma_semaphore, #tpu.memory_space<semaphore_mem>> -> memref<!tpu.dma_semaphore, #tpu.memory_space<semaphore_mem>>
    tpu.wait_dma2 semaphore(%67 : memref<!tpu.dma_semaphore, #tpu.memory_space<semaphore_mem>>) src(%64 : memref<1x32xf32, #tpu.memory_space<any>>) dst(%65 : memref<1x32xf32, #tpu.memory_space<vmem>>)
    %c7_i32_59 = arith.constant 7 : i32
    %c0_i32_60 = arith.constant 0 : i32
    %c0_i32_61 = arith.constant 0 : i32
    %68 = tpu.memref_slice %arg1[%c0_i32_60, %c0_i32_61] : memref<128x32xf32, #tpu.memory_space<any>> -> memref<1x32xf32, #tpu.memory_space<any>>
    %c7_i32_62 = arith.constant 7 : i32
    %c0_i32_63 = arith.constant 0 : i32
    %69 = tpu.memref_slice %arg13[%c7_i32_62, %c0_i32_63] : memref<8x32xf32, #tpu.memory_space<vmem>> -> memref<1x32xf32, #tpu.memory_space<vmem>>
    %70 = tpu.memref_slice %arg14[%c7_i32_59] : memref<8x!tpu.dma_semaphore, #tpu.memory_space<semaphore_mem>> -> memref<1x!tpu.dma_semaphore, #tpu.memory_space<semaphore_mem>>
    %71 = tpu.memref_squeeze %70 : memref<1x!tpu.dma_semaphore, #tpu.memory_space<semaphore_mem>> -> memref<!tpu.dma_semaphore, #tpu.memory_space<semaphore_mem>>
    tpu.wait_dma2 semaphore(%71 : memref<!tpu.dma_semaphore, #tpu.memory_space<semaphore_mem>>) src(%68 : memref<1x32xf32, #tpu.memory_space<any>>) dst(%69 : memref<1x32xf32, #tpu.memory_space<vmem>>)
    %c0_64 = arith.constant 0 : index
    %c0_65 = arith.constant 0 : index
    %72 = vector.load %arg13[%c0_64, %c0_65] : memref<8x32xf32, #tpu.memory_space<vmem>>, vector<8x32xf32>
    %c0_66 = arith.constant 0 : index
    %c0_67 = arith.constant 0 : index
    %c0_68 = arith.constant 0 : index
    %73 = vector.load %arg2[%c0_66, %c0_67, %c0_68] : memref<2x8x32xf32, #tpu.memory_space<vmem>>, vector<1x8x32xf32>
    %74 = vector.shape_cast %73 : vector<1x8x32xf32> to vector<8x32xf32>
    %75 = arith.truncf %72 : vector<8x32xf32> to vector<8x32xbf16>
    %c0_69 = arith.constant 0 : index
    %c0_70 = arith.constant 0 : index
    %c0_71 = arith.constant 0 : index
    %76 = vector.load %arg3[%c0_69, %c0_70, %c0_71] : memref<2x32x96xbf16, #tpu.memory_space<vmem>>, vector<1x32x96xbf16>
    %77 = vector.shape_cast %76 : vector<1x32x96xbf16> to vector<32x96xbf16>
    %cst = arith.constant dense<0.000000e+00> : vector<8x96xf32>
    %78 = tpu.matmul %75, %77, %cst {dimension_numbers = #tpu.dot_dimension_numbers<[1], [0], [0], [1], [0, 0, 1, 1], [], []>} : vector<8x32xbf16>, vector<32x96xbf16>, vector<8x96xf32> -> vector<8x96xf32>
    %c0_72 = arith.constant 0 : index
    %c0_73 = arith.constant 0 : index
    %c0_74 = arith.constant 0 : index
    %79 = vector.load %arg5[%c0_72, %c0_73, %c0_74] : memref<2x1x96xf32, #tpu.memory_space<vmem>>, vector<1x1x96xf32>
    %80 = vector.shape_cast %79 : vector<1x1x96xf32> to vector<1x96xf32>
    %81 = vector.broadcast %80 : vector<1x96xf32> to vector<8x96xf32>
    %82 = arith.addf %78, %81 : vector<8x96xf32>
    %83 = arith.truncf %74 : vector<8x32xf32> to vector<8x32xbf16>
    %c0_75 = arith.constant 0 : index
    %c0_76 = arith.constant 0 : index
    %c0_77 = arith.constant 0 : index
    %84 = vector.load %arg4[%c0_75, %c0_76, %c0_77] : memref<2x32x96xbf16, #tpu.memory_space<vmem>>, vector<1x32x96xbf16>
    %85 = vector.shape_cast %84 : vector<1x32x96xbf16> to vector<32x96xbf16>
    %cst_78 = arith.constant dense<0.000000e+00> : vector<8x96xf32>
    %86 = tpu.matmul %83, %85, %cst_78 {dimension_numbers = #tpu.dot_dimension_numbers<[1], [0], [0], [1], [0, 0, 1, 1], [], []>} : vector<8x32xbf16>, vector<32x96xbf16>, vector<8x96xf32> -> vector<8x96xf32>
    %c0_79 = arith.constant 0 : index
    %c0_80 = arith.constant 0 : index
    %c0_81 = arith.constant 0 : index
    %87 = vector.load %arg6[%c0_79, %c0_80, %c0_81] : memref<2x1x96xf32, #tpu.memory_space<vmem>>, vector<1x1x96xf32>
    %88 = vector.shape_cast %87 : vector<1x1x96xf32> to vector<1x96xf32>
    %89 = vector.broadcast %88 : vector<1x96xf32> to vector<8x96xf32>
    %90 = arith.addf %86, %89 : vector<8x96xf32>
    %91 = vector.extract_strided_slice %82 {offsets = [0, 0], sizes = [8, 32], strides = [1, 1]} : vector<8x96xf32> to vector<8x32xf32>
    %92 = vector.extract_strided_slice %90 {offsets = [0, 0], sizes = [8, 32], strides = [1, 1]} : vector<8x96xf32> to vector<8x32xf32>
    %93 = arith.addf %91, %92 : vector<8x32xf32>
    %94 = arith.negf %93 : vector<8x32xf32>
    %95 = math.exp %94 : vector<8x32xf32>
    %cst_82 = arith.constant 1.000000e+00 : f32
    %96 = vector.broadcast %cst_82 : f32 to vector<8x32xf32>
    %97 = arith.addf %96, %95 : vector<8x32xf32>
    %98 = arith.divf %96, %97 : vector<8x32xf32>
    %99 = vector.extract_strided_slice %82 {offsets = [0, 32], sizes = [8, 32], strides = [1, 1]} : vector<8x96xf32> to vector<8x32xf32>
    %100 = vector.extract_strided_slice %90 {offsets = [0, 32], sizes = [8, 32], strides = [1, 1]} : vector<8x96xf32> to vector<8x32xf32>
    %101 = arith.addf %99, %100 : vector<8x32xf32>
    %102 = arith.negf %101 : vector<8x32xf32>
    %103 = math.exp %102 : vector<8x32xf32>
    %cst_83 = arith.constant 1.000000e+00 : f32
    %104 = vector.broadcast %cst_83 : f32 to vector<8x32xf32>
    %105 = arith.addf %104, %103 : vector<8x32xf32>
    %106 = arith.divf %104, %105 : vector<8x32xf32>
    %107 = vector.extract_strided_slice %82 {offsets = [0, 64], sizes = [8, 32], strides = [1, 1]} : vector<8x96xf32> to vector<8x32xf32>
    %108 = vector.extract_strided_slice %90 {offsets = [0, 64], sizes = [8, 32], strides = [1, 1]} : vector<8x96xf32> to vector<8x32xf32>
    %109 = arith.mulf %98, %108 : vector<8x32xf32>
    %110 = arith.addf %107, %109 : vector<8x32xf32>
    %111 = math.tanh %110 : vector<8x32xf32>
    %cst_84 = arith.constant 1.000000e+00 : f32
    %112 = vector.broadcast %cst_84 : f32 to vector<8x32xf32>
    %113 = arith.subf %112, %106 : vector<8x32xf32>
    %114 = arith.mulf %113, %111 : vector<8x32xf32>
    %115 = arith.mulf %106, %74 : vector<8x32xf32>
    %116 = arith.addf %114, %115 : vector<8x32xf32>
    %c0_85 = arith.constant 0 : index
    %c0_86 = arith.constant 0 : index
    %c0_87 = arith.constant 0 : index
    %117 = vector.load %arg12[%c0_85, %c0_86, %c0_87] : memref<2x8x32xf32, #tpu.memory_space<vmem>>, vector<1x8x32xf32>
    %118 = vector.shape_cast %117 : vector<1x8x32xf32> to vector<8x32xf32>
    %119 = vector.shape_cast %116 : vector<8x32xf32> to vector<1x8x32xf32>
    tpu.vector_store %arg12[%c0_85, %c0_86, %c0_87], %119 {strides = array<i32>} : memref<2x8x32xf32, #tpu.memory_space<vmem>>, vector<1x8x32xf32>,
    %c1_88 = arith.constant 1 : index
    %c0_89 = arith.constant 0 : index
    %c0_90 = arith.constant 0 : index
    %120 = vector.load %arg2[%c1_88, %c0_89, %c0_90] : memref<2x8x32xf32, #tpu.memory_space<vmem>>, vector<1x8x32xf32>
    %121 = vector.shape_cast %120 : vector<1x8x32xf32> to vector<8x32xf32>
    %122 = arith.truncf %116 : vector<8x32xf32> to vector<8x32xbf16>
    %c1_91 = arith.constant 1 : index
    %c0_92 = arith.constant 0 : index
    %c0_93 = arith.constant 0 : index
    %123 = vector.load %arg3[%c1_91, %c0_92, %c0_93] : memref<2x32x96xbf16, #tpu.memory_space<vmem>>, vector<1x32x96xbf16>
    %124 = vector.shape_cast %123 : vector<1x32x96xbf16> to vector<32x96xbf16>
    %cst_94 = arith.constant dense<0.000000e+00> : vector<8x96xf32>
    %125 = tpu.matmul %122, %124, %cst_94 {dimension_numbers = #tpu.dot_dimension_numbers<[1], [0], [0], [1], [0, 0, 1, 1], [], []>} : vector<8x32xbf16>, vector<32x96xbf16>, vector<8x96xf32> -> vector<8x96xf32>
    %c1_95 = arith.constant 1 : index
    %c0_96 = arith.constant 0 : index
    %c0_97 = arith.constant 0 : index
    %126 = vector.load %arg5[%c1_95, %c0_96, %c0_97] : memref<2x1x96xf32, #tpu.memory_space<vmem>>, vector<1x1x96xf32>
    %127 = vector.shape_cast %126 : vector<1x1x96xf32> to vector<1x96xf32>
    %128 = vector.broadcast %127 : vector<1x96xf32> to vector<8x96xf32>
    %129 = arith.addf %125, %128 : vector<8x96xf32>
    %130 = arith.truncf %121 : vector<8x32xf32> to vector<8x32xbf16>
    %c1_98 = arith.constant 1 : index
    %c0_99 = arith.constant 0 : index
    %c0_100 = arith.constant 0 : index
    %131 = vector.load %arg4[%c1_98, %c0_99, %c0_100] : memref<2x32x96xbf16, #tpu.memory_space<vmem>>, vector<1x32x96xbf16>
    %132 = vector.shape_cast %131 : vector<1x32x96xbf16> to vector<32x96xbf16>
    %cst_101 = arith.constant dense<0.000000e+00> : vector<8x96xf32>
    %133 = tpu.matmul %130, %132, %cst_101 {dimension_numbers = #tpu.dot_dimension_numbers<[1], [0], [0], [1], [0, 0, 1, 1], [], []>} : vector<8x32xbf16>, vector<32x96xbf16>, vector<8x96xf32> -> vector<8x96xf32>
    %c1_102 = arith.constant 1 : index
    %c0_103 = arith.constant 0 : index
    %c0_104 = arith.constant 0 : index
    %134 = vector.load %arg6[%c1_102, %c0_103, %c0_104] : memref<2x1x96xf32, #tpu.memory_space<vmem>>, vector<1x1x96xf32>
    %135 = vector.shape_cast %134 : vector<1x1x96xf32> to vector<1x96xf32>
    %136 = vector.broadcast %135 : vector<1x96xf32> to vector<8x96xf32>
    %137 = arith.addf %133, %136 : vector<8x96xf32>
    %138 = vector.extract_strided_slice %129 {offsets = [0, 0], sizes = [8, 32], strides = [1, 1]} : vector<8x96xf32> to vector<8x32xf32>
    %139 = vector.extract_strided_slice %137 {offsets = [0, 0], sizes = [8, 32], strides = [1, 1]} : vector<8x96xf32> to vector<8x32xf32>
    %140 = arith.addf %138, %139 : vector<8x32xf32>
    %141 = arith.negf %140 : vector<8x32xf32>
    %142 = math.exp %141 : vector<8x32xf32>
    %cst_105 = arith.constant 1.000000e+00 : f32
    %143 = vector.broadcast %cst_105 : f32 to vector<8x32xf32>
    %144 = arith.addf %143, %142 : vector<8x32xf32>
    %145 = arith.divf %143, %144 : vector<8x32xf32>
    %146 = vector.extract_strided_slice %129 {offsets = [0, 32], sizes = [8, 32], strides = [1, 1]} : vector<8x96xf32> to vector<8x32xf32>
    %147 = vector.extract_strided_slice %137 {offsets = [0, 32], sizes = [8, 32], strides = [1, 1]} : vector<8x96xf32> to vector<8x32xf32>
    %148 = arith.addf %146, %147 : vector<8x32xf32>
    %149 = arith.negf %148 : vector<8x32xf32>
    %150 = math.exp %149 : vector<8x32xf32>
    %cst_106 = arith.constant 1.000000e+00 : f32
    %151 = vector.broadcast %cst_106 : f32 to vector<8x32xf32>
    %152 = arith.addf %151, %150 : vector<8x32xf32>
    %153 = arith.divf %151, %152 : vector<8x32xf32>
    %154 = vector.extract_strided_slice %129 {offsets = [0, 64], sizes = [8, 32], strides = [1, 1]} : vector<8x96xf32> to vector<8x32xf32>
    %155 = vector.extract_strided_slice %137 {offsets = [0, 64], sizes = [8, 32], strides = [1, 1]} : vector<8x96xf32> to vector<8x32xf32>
    %156 = arith.mulf %145, %155 : vector<8x32xf32>
    %157 = arith.addf %154, %156 : vector<8x32xf32>
    %158 = math.tanh %157 : vector<8x32xf32>
    %cst_107 = arith.constant 1.000000e+00 : f32
    %159 = vector.broadcast %cst_107 : f32 to vector<8x32xf32>
    %160 = arith.subf %159, %153 : vector<8x32xf32>
    %161 = arith.mulf %160, %158 : vector<8x32xf32>
    %162 = arith.mulf %153, %121 : vector<8x32xf32>
    %163 = arith.addf %161, %162 : vector<8x32xf32>
    %c1_108 = arith.constant 1 : index
    %c0_109 = arith.constant 0 : index
    %c0_110 = arith.constant 0 : index
    %164 = vector.load %arg12[%c1_108, %c0_109, %c0_110] : memref<2x8x32xf32, #tpu.memory_space<vmem>>, vector<1x8x32xf32>
    %165 = vector.shape_cast %164 : vector<1x8x32xf32> to vector<8x32xf32>
    %166 = vector.shape_cast %163 : vector<8x32xf32> to vector<1x8x32xf32>
    tpu.vector_store %arg12[%c1_108, %c0_109, %c0_110], %166 {strides = array<i32>} : memref<2x8x32xf32, #tpu.memory_space<vmem>>, vector<1x8x32xf32>,
    %167 = arith.truncf %163 : vector<8x32xf32> to vector<8x32xbf16>
    %c0_111 = arith.constant 0 : index
    %c0_112 = arith.constant 0 : index
    %168 = vector.load %arg7[%c0_111, %c0_112] : memref<32x64xbf16, #tpu.memory_space<vmem>>, vector<32x64xbf16>
    %cst_113 = arith.constant dense<0.000000e+00> : vector<8x64xf32>
    %169 = tpu.matmul %167, %168, %cst_113 {dimension_numbers = #tpu.dot_dimension_numbers<[1], [0], [0], [1], [0, 0, 1, 1], [], []>} : vector<8x32xbf16>, vector<32x64xbf16>, vector<8x64xf32> -> vector<8x64xf32>
    %c0_114 = arith.constant 0 : index
    %c0_115 = arith.constant 0 : index
    %170 = vector.load %arg8[%c0_114, %c0_115] : memref<1x64xf32, #tpu.memory_space<vmem>>, vector<1x64xf32>
    %171 = vector.broadcast %170 : vector<1x64xf32> to vector<8x64xf32>
    %172 = arith.addf %169, %171 : vector<8x64xf32>
    %173 = arith.truncf %172 : vector<8x64xf32> to vector<8x64xbf16>
    %c0_116 = arith.constant 0 : index
    %c0_117 = arith.constant 0 : index
    %174 = vector.load %arg9[%c0_116, %c0_117] : memref<64x128xbf16, #tpu.memory_space<vmem>>, vector<64x128xbf16>
    %cst_118 = arith.constant dense<0.000000e+00> : vector<8x128xf32>
    %175 = tpu.matmul %173, %174, %cst_118 {dimension_numbers = #tpu.dot_dimension_numbers<[1], [0], [0], [1], [0, 0, 1, 1], [], []>} : vector<8x64xbf16>, vector<64x128xbf16>, vector<8x128xf32> -> vector<8x128xf32>
    %c0_119 = arith.constant 0 : index
    %c0_120 = arith.constant 0 : index
    %176 = vector.load %arg10[%c0_119, %c0_120] : memref<1x128xf32, #tpu.memory_space<vmem>>, vector<1x128xf32>
    %177 = vector.broadcast %176 : vector<1x128xf32> to vector<8x128xf32>
    %178 = arith.addf %175, %177 : vector<8x128xf32>
    %179 = arith.truncf %178 : vector<8x128xf32> to vector<8x128xbf16>
    %c0_121 = arith.constant 0 : index
    %c0_122 = arith.constant 0 : index
    %180 = vector.load %arg11[%c0_121, %c0_122] : memref<8x128xbf16, #tpu.memory_space<vmem>>, vector<8x128xbf16>
    tpu.vector_store %arg11[%c0_121, %c0_122], %179 {strides = array<i32>} : memref<8x128xbf16, #tpu.memory_space<vmem>>, vector<8x128xbf16>,
    return
  }
}

</mosaic_0001>

<bundles_post_ra>
// kernel: tpu_custom_call.1
= control target key start
LH: loop header
LB: loop body
LE: loop exit
PB: predicated region body
PF: predicated region fallthrough
CT: control target
= control target key end

     0   :  { %18 = vsyncpa [#allocation6], 0  ;;  %s1257_s0 = inlined_call_operand.vmem [shape: s32[8], index: 0, kind: input, shape index: {}]   ;;  %s1258_s1 = inlined_call_operand.vmem [shape: f32[128,32], index: 1, kind: input, shape index: {}]   ;;  %s1259_s2 = inlined_call_operand.vmem [shape: f32[2,8,32], index: 2, kind: input, shape index: {}]   ;;  %s1260_s3 = inlined_call_operand.vmem [shape: bf16[2,32,96], index: 3, kind: input, shape index: {}]   ;;  %s1261_s4 = inlined_call_operand.vmem [shape: bf16[2,32,96], index: 4, kind: input, shape index: {}]   ;;  %s1262_s5 = inlined_call_operand.vmem [shape: f32[2,1,96], index: 5, kind: input, shape index: {}]   ;;  %s1263_s6 = inlined_call_operand.vmem [shape: f32[2,1,96], index: 6, kind: input, shape index: {}]   ;;  %s1264_s7 = inlined_call_operand.vmem [shape: bf16[32,64], index: 7, kind: input, shape index: {}]   ;;  %s1265_s8 = inlined_call_operand.vmem [shape: f32[1,64], index: 8, kind: input, shape index: {}]   ;;  %s1266_s9 = inlined_call_operand.vmem [shape: bf16[64,128], index: 9, kind: input, shape index: {}]   ;;  %s1267_s10 = inlined_call_operand.vmem [shape: f32[1,128], index: 10, kind: input, shape index: {}]   ;;  %s1268_s11 = inlined_call_operand.hbm [shape: bf16[8,128], index: 11, kind: output, shape index: {0}]   ;;  %s1269_s12 = inlined_call_operand.hbm [shape: f32[2,8,32], index: 12, kind: output, shape index: {1}]  }
   0x1   :  { %19 = vsyncpa [#allocation5], 0 }
   0x2   :  { %20 = vsyncpa [#allocation9], 0  ;;  %s26_s23 = sshll.u32 %s1257_s0, 4  ;;  %s1068_s24 = smov [#allocation4]   ;;  %s27_s23 = int_to_ptr.vmem [resolvable:$true] %s26_s23 }
   0x3   :  { %29 = dma.vmem_to_smem %s27_s23, 16, %s1068_s24, [#allocation6]  }
   0x4   :  { %1046 = dma.done.wait [#allocation6], 16  }
   0x5   :  { %1047 = vsyncadd [#allocation6], 4294967280 }
   0x6   :  { %52 = sfence }
   0x7   :  { %s54_s25 = sld [smem:[#allocation4]] }
   0xd   :  { %s55_s28 = scalar_lea.vmem %s1258_s1, %s54_s25 }
   0xe   :  { %v70_v0 = vld [vmem:[%s55_s28] sm:$0x1] }
   0xf   :  { %71 = vst [vmem:[#allocation2] sm:$0x1] %v70_v0 }
  0x10   :  { %89 = vsyncadd [#allocation3], 16  ;;  %s856_s29 = sld [smem:[#allocation4 + $0x1]] }
  0x16   :  { %s91_s14 = scalar_lea.vmem %s1258_s1, %s856_s29 }
  0x17   :  { %v108_v1 = vld [vmem:[%s91_s14] sm:$0x1] }
  0x18   :  { %109 = vst [vmem:[#allocation2 + $0x1] sm:$0x1] %v108_v1 }
  0x19   :  { %127 = vsyncadd [#allocation3 + $0x1], 16  ;;  %s857_s0 = sld [smem:[#allocation4 + $0x2]] }
  0x1f   :  { %s129_s17 = scalar_lea.vmem %s1258_s1, %s857_s0 }
  0x20   :  { %v146_v2 = vld [vmem:[%s129_s17] sm:$0x1] }
  0x21   :  { %147 = vst [vmem:[#allocation2 + $0x2] sm:$0x1] %v146_v2 }
  0x22   :  { %165 = vsyncadd [#allocation3 + $0x2], 16  ;;  %s858_s18 = sld [smem:[#allocation4 + $0x3]] }
  0x28   :  { %s167_s21 = scalar_lea.vmem %s1258_s1, %s858_s18 }
  0x29   :  { %v184_v3 = vld [vmem:[%s167_s21] sm:$0x1] }
  0x2a   :  { %185 = vst [vmem:[#allocation2 + $0x3] sm:$0x1] %v184_v3 }
  0x2b   :  { %203 = vsyncadd [#allocation3 + $0x3], 16  ;;  %s859_s22 = sld [smem:[#allocation4 + $0x4]] }
  0x31   :  { %s205_s25 = scalar_lea.vmem %s1258_s1, %s859_s22 }
  0x32   :  { %v222_v4 = vld [vmem:[%s205_s25] sm:$0x1] }
  0x33   :  { %223 = vst [vmem:[#allocation2 + $0x4] sm:$0x1] %v222_v4 }
  0x34   :  { %241 = vsyncadd [#allocation3 + $0x4], 16  ;;  %s860_s26 = sld [smem:[#allocation4 + $0x5]] }
  0x3a   :  { %s243_s29 = scalar_lea.vmem %s1258_s1, %s860_s26 }
  0x3b   :  { %v260_v5 = vld [vmem:[%s243_s29] sm:$0x1] }
  0x3c   :  { %261 = vst [vmem:[#allocation2 + $0x5] sm:$0x1] %v260_v5 }
  0x3d   :  { %279 = vsyncadd [#allocation3 + $0x5], 16  ;;  %s861_s30 = sld [smem:[#allocation4 + $0x6]] }
  0x43   :  { %s281_s0 = scalar_lea.vmem %s1258_s1, %s861_s30 }
  0x44   :  { %v298_v6 = vld [vmem:[%s281_s0] sm:$0x1] }
  0x45   :  { %299 = vst [vmem:[#allocation2 + $0x6] sm:$0x1] %v298_v6 }
  0x46   :  { %317 = vsyncadd [#allocation3 + $0x6], 16  ;;  %s862_s15 = sld [smem:[#allocation4 + $0x7]] }
  0x4c   :  { %s319_s18 = scalar_lea.vmem %s1258_s1, %s862_s15 }
  0x4d   :  { %v336_v7 = vld [vmem:[%s319_s18] sm:$0x1] }
  0x4e   :  { %337 = vst [vmem:[#allocation2 + $0x7] sm:$0x1] %v336_v7 }
  0x4f   :  { %355 = vsyncadd [#allocation3 + $0x7], 16 }
  0x50   :  { %1048 = dma.done.wait [#allocation3], 16 }
  0x51   :  { %1049 = vsyncadd [#allocation3], 4294967280 }
  0x52   :  { %1050 = dma.done.wait [#allocation3 + $0x1], 16 }
  0x53   :  { %1051 = vsyncadd [#allocation3 + $0x1], 4294967280 }
  0x54   :  { %1052 = dma.done.wait [#allocation3 + $0x2], 16 }
  0x55   :  { %1053 = vsyncadd [#allocation3 + $0x2], 4294967280 }
  0x56   :  { %1054 = dma.done.wait [#allocation3 + $0x3], 16 }
  0x57   :  { %1055 = vsyncadd [#allocation3 + $0x3], 4294967280 }
  0x58   :  { %1056 = dma.done.wait [#allocation3 + $0x4], 16 }
  0x59   :  { %1057 = vsyncadd [#allocation3 + $0x4], 4294967280 }
  0x5a   :  { %1058 = dma.done.wait [#allocation3 + $0x5], 16 }
  0x5b   :  { %1059 = vsyncadd [#allocation3 + $0x5], 4294967280 }
  0x5c   :  { %1060 = dma.done.wait [#allocation3 + $0x6], 16 }
  0x5d   :  { %1061 = vsyncadd [#allocation3 + $0x6], 4294967280 }
  0x5e   :  { %1062 = dma.done.wait [#allocation3 + $0x7], 16 }
  0x5f   :  { %1063 = vsyncadd [#allocation3 + $0x7], 4294967280  ;;  %v947_v8 = vld [vmem:[%s1260_s3 + $0x8] sm:$0xff]  ;;  %v946_v10 = vld [vmem:[%s1260_s3] sm:$0xff]  ;;  %vm396_vm0 = vcmask 261120   ;;  %s1069_s30 = smov 64  }
  0x60   :  { %v949_v9 = vld [vmem:[%s1261_s4 + $0x8] sm:$0xff]  ;;  %v948_v11 = vld [vmem:[%s1261_s4] sm:$0xff]  ;;  %406 = vmatpush.bf16.msra.mxu0 %v947_v8  ;;  %s1070_s0 = smov 96   ;;  %s1071_s15 = smov 32   ;;  %v953_v43 = vld [vmem:[%s1261_s4 + $0x18] sm:$0xff]  ;;  %vm707_vm9 = vcmask 523264  }
  0x61   :  { %v373_v12 = vld [vmem:[#allocation2] sm:$0xff]  ;;  %443 = vmatpush.bf16.msra.mxu1 %v949_v9  ;;  %v951_v44 = vld [vmem:[%s1260_s3 + $0x18] sm:$0xff]  ;;  %574 = vmatpush.bf16.msra.mxu3 %v953_v43  ;;  %v952_v45 = vld [vmem:[%s1261_s4 + $0x10] sm:$0xff]  ;;  %s1072_s18 = smov [#allocation8]   ;;  %s743_s21 = sshll.u32 %s1269_s12, 4  ;;  %s744_s21 = int_to_ptr.hbm [resolvable:$true] %s743_s21 }
  0x62   :  { %v374_v13 = vld [vmem:[%s1259_s2] sm:$0xff]  ;;  %v375_v14 = vpack.c.bf16 %v373_v12, %v373_v12  ;;  %v882_v46 = vld [vmem:[%s1259_s2 + $0x8] sm:$0xff]  ;;  %535 = vmatpush.bf16.msra.mxu2 %v951_v44  ;;  %v950_v47 = vld [vmem:[%s1260_s3 + $0x10] sm:$0xff]  ;;  %s741_s1 = sshll.u32 %s1072_s18, 4  ;;  %s1074_s22 = smov 8   ;;  %s742_s1 = int_to_ptr.vmem [resolvable:$true] %s741_s1 }
  0x63   :  { %v413_v15 = vpack.c.bf16 %v374_v13, %v374_v13  ;;  %v969_v16 = vld [vmem:[%s1263_s6] ss:$0 sm:$0xff]  ;;  %v542_v48 = vpack.c.bf16 %v882_v46, %v882_v46  ;;  %v970_v57 = vld [vmem:[%s1263_s6 + $0x1] ss:$0 sm:$0xff]  ;;  %s733_s25 = sshll.u32 %s1268_s11, 4  ;;  %s734_s25 = int_to_ptr.hbm [resolvable:$true] %s733_s25 }
  0x64   :  { %407 = vmatpush.bf16.msra.mxu0 %v946_v10  ;;  %v968_v22 = vld [vmem:[%s1262_s5] ss:$0 sm:$0xff]  ;;  %v971_v61 = vld [vmem:[%s1262_s5 + $0x1] ss:$0 sm:$0xff] }
  0x65   :  { %444 = vmatpush.bf16.msra.mxu1 %v948_v11  ;;  %575 = vmatpush.bf16.msra.mxu3 %v952_v45 }
  0x66   :  { %536 = vmatpush.bf16.msra.mxu2 %v950_v47 }
  0x67   :  { %871 = vmatmul.msk.bf16.vlgmr.msra.gmra.mxu0 %vm396_vm0, %v375_v14 }
  0x68   :  { %880 = vmatmul.msk.bf16.vlgmr.msra.gmra.mxu1 %vm396_vm0, %v413_v15  ;;  %910 = vmatmul.msk.bf16.vlgmr.msra.gmra.mxu3 %vm396_vm0, %v542_v48 }
  0xe4   :  { %v409_v17 = vpop.f32.mrf.mxu0 }
  0xe5   :  { %v446_v18 = vpop.f32.mrf.mxu1  ;;  %v410_v23 = vadd.f32 %v968_v22, %v409_v17 }
  0xe6   :  { %v447_v19 = vadd.f32 %v969_v16, %v446_v18 }
  0xe8   :  { %471 = vrot.lane.b32.xlu0 %v447_v19, %s1069_s30  ;;  %v450_v24 = vadd.f32 %v447_v19, %v410_v23 }
  0xea   :  { %v881_v25 = vmul.f32 -1.442695, %v450_v24 }
  0xeb   :  { %v577_v58 = vpop.f32.mrf.mxu3 }
  0xec   :  { %v411_v21 = vpop.f32.mrf.mxu0  ;;  %974 = vpow2.f32 %v881_v25  ;;  %v578_v59 = vadd.f32 %v970_v57, %v577_v58 }
  0xed   :  { %v448_v20 = vpop.f32.mrf.mxu1 }
  0xf2   :  { %v975_v26 = vpop.eup %974 }
  0xf3   :  { %v454_v27 = vadd.f32 1.0, %v975_v26  ;;  %v579_v60 = vpop.f32.mrf.mxu3 }
  0xf5   :  { %976 = vrcp.f32 %v454_v27  ;;  %v466_v33 = vand.u32 2147483648, %v454_v27  ;;  %vm460_vm2 = vweird.f32 %v454_v27  ;;  %v464_v34 = vand.u32 2147483647, %v454_v27 }
  0xf7   :  { %v467_v36 = vor.u32 1.1754944e-38, %v466_v33  ;;  %vm465_vm4 = vcmp.eq.f32.partialorder %v464_v34, 8.507059e+37  ;;  %v957_v33 = vld [vmem:[%s1266_s9 + $0x8] sm:$0xff] }
  0xfb   :  { %v977_v28 = vpop.eup %976 }
  0xfc   :  { %v456_v29 = vmul.f32 %v977_v28, %v454_v27  ;;  %vm461_vm1 = vweird.f32 %v977_v28 }
  0xfd   :  { %vm462_vm3 = vmor %vm460_vm2, %vm461_vm1 }
  0xfe   :  { %v457_v30 = vsub.f32 1.0, %v456_v29  ;;  %v954_v29 = vld [vmem:[%s1264_s7] sm:$0xff] }
 0x100   :  { %v458_v31 = vmul.f32 %v977_v28, %v457_v30  ;;  %v959_v30 = vld [vmem:[%s1266_s9 + $0x18] sm:$0xff] }
 0x101   :  { %715 = vmatpush.bf16.msrb.mxu1 %v959_v30 }
 0x102   :  { %v459_v32 = vadd.f32 %v977_v28, %v458_v31  ;;  %v958_v31 = vld [vmem:[%s1266_s9 + $0x10] sm:$0xff] }
 0x104   :  { %v463_v35 = vsel %vm462_vm3, %v977_v28, %v459_v32  ;;  %v955_v28 = vld [vmem:[%s1264_s7 + $0x8] sm:$0xff] }
 0x105   :  { %v468_v38 = vsel %vm465_vm4, %v467_v36, %v463_v35  ;;  %663 = vmatpush.bf16.msrb.mxu0 %v955_v28  ;;  %716 = vmatpush.bf16.msrb.mxu1 %v958_v31  ;;  %v956_v35 = vld [vmem:[%s1266_s9] sm:$0xff]  ;;  %s1073_s9 = smov 128  }
 0x106   :  { %v481_v50 = vsub.f32 1.0, %v468_v38  ;;  %v972_v36 = vld [vmem:[%s1265_s8] ss:$0 sm:$0xff]  ;;  %s1075_s8 = smov [#allocation7]  }
 0x107   :  { %s731_s2 = sshll.u32 %s1075_s8, 4  ;;  %s732_s2 = int_to_ptr.vmem [resolvable:$true] %s731_s2 }
 0x109   :  { %664 = vmatpush.bf16.msrb.mxu0 %v954_v29  ;;  %717 = vmatpush.bf16.msrb.mxu1 %v957_v33 }
 0x10d   :  { %718 = vmatpush.bf16.msrb.mxu1 %v956_v35 }
 0x15a   :  { %v472_v37 = vpop.permute.xlu0 %471 }
 0x15b   :  { %v474_v39 = vmul.f32 %v472_v37, %v468_v38 }
 0x15d   :  { %476 = vrot.lane.b32.xlu0 %v474_v39, %s1069_s30 }
 0x1cf   :  { %v477_v40 = vpop.permute.xlu0 %476 }
 0x1d0   :  { %v479_v41 = vadd.f32 %v477_v40, %v410_v23 }
 0x1d2   :  { %978 = vtanh.f32 %v479_v41  ;;  %v973_v41 = vld [vmem:[%s1267_s10] ss:$0 sm:$0xff] }
 0x1d8   :  { %v979_v42 = vpop.eup %978 }
 0x1d9   :  { %483 = vrot.lane.b32.xlu1 %v979_v42, %s1070_s0 }
 0x1e1   :  { %488 = vrot.lane.b32.xlu1 %v374_v13, %s1071_s15 }
 0x24b   :  { %v484_v49 = vpop.permute.xlu1 %483 }
 0x24c   :  { %v486_v52 = vmul.f32 %v484_v49, %v481_v50 }
 0x253   :  { %v489_v51 = vpop.permute.xlu1 %488 }
 0x254   :  { %v491_v53 = vmul.f32 %v489_v51, %v468_v38 }
 0x256   :  { %v492_v54 = vadd.f32 %v491_v53, %v486_v52 }
 0x258   :  { %v500_v55 = vpack.c.bf16 %v492_v54, %v492_v54 }
 0x25a   :  { %512 = vrot.lane.b32.xlu2 %v500_v55, %s1070_s0 }
 0x262   :  { %602 = vrot.lane.b32.xlu2 %v578_v59, %s1069_s30 }
 0x26a   :  { %619 = vrot.lane.b32.xlu2 %v882_v46, %s1071_s15 }
 0x2b4   :  { %v513_v56 = vpop.permute.xlu2 %512 }
 0x2b5   :  { %896 = vmatmul.msk.bf16.vlgmr.msra.gmra.mxu2 %vm396_vm0, %v513_v56 }
 0x2bc   :  { %v603_v15 = vpop.permute.xlu2 %602 }
 0x2c4   :  { %v620_v20 = vpop.permute.xlu2 %619 }
 0x338   :  { %v538_v62 = vpop.f32.mrf.mxu2 }
 0x339   :  { %v539_v63 = vadd.f32 %v971_v61, %v538_v62 }
 0x33b   :  { %v581_v0 = vadd.f32 %v578_v59, %v539_v63 }
 0x33d   :  { %v911_v1 = vmul.f32 -1.442695, %v581_v0 }
 0x33f   :  { %980 = vpow2.f32 %v911_v1 }
 0x340   :  { %v540_v2 = vpop.f32.mrf.mxu2 }
 0x345   :  { %v981_v3 = vpop.eup %980 }
 0x346   :  { %v585_v4 = vadd.f32 1.0, %v981_v3 }
 0x348   :  { %982 = vrcp.f32 %v585_v4  ;;  %v597_v8 = vand.u32 2147483648, %v585_v4  ;;  %v595_v10 = vand.u32 2147483647, %v585_v4  ;;  %vm591_vm6 = vweird.f32 %v585_v4 }
 0x34a   :  { %v598_v12 = vor.u32 1.1754944e-38, %v597_v8  ;;  %vm596_vm8 = vcmp.eq.f32.partialorder %v595_v10, 8.507059e+37 }
 0x34e   :  { %v983_v5 = vpop.eup %982 }
 0x34f   :  { %v587_v6 = vmul.f32 %v983_v5, %v585_v4  ;;  %vm592_vm5 = vweird.f32 %v983_v5 }
 0x350   :  { %vm593_vm7 = vmor %vm591_vm6, %vm592_vm5 }
 0x351   :  { %v588_v7 = vsub.f32 1.0, %v587_v6 }
 0x353   :  { %v589_v9 = vmul.f32 %v983_v5, %v588_v7 }
 0x355   :  { %v590_v11 = vadd.f32 %v983_v5, %v589_v9 }
 0x357   :  { %v594_v13 = vsel %vm593_vm7, %v983_v5, %v590_v11 }
 0x358   :  { %v599_v14 = vsel %vm596_vm8, %v598_v12, %v594_v13 }
 0x359   :  { %v605_v16 = vmul.f32 %v603_v15, %v599_v14  ;;  %v612_v21 = vsub.f32 1.0, %v599_v14  ;;  %v622_v23 = vmul.f32 %v620_v20, %v599_v14 }
 0x35b   :  { %607 = vrot.lane.b32.xlu0 %v605_v16, %s1069_s30 }
 0x3cd   :  { %v608_v17 = vpop.permute.xlu0 %607 }
 0x3ce   :  { %v610_v18 = vadd.f32 %v608_v17, %v539_v63 }
 0x3d0   :  { %984 = vtanh.f32 %v610_v18 }
 0x3d6   :  { %v985_v19 = vpop.eup %984 }
 0x3d7   :  { %614 = vrot.lane.b32.xlu1 %v985_v19, %s1070_s0 }
 0x3df   :  { %494 = vrot.lane.b32.xlu1 %v492_v54, %s1070_s0 }
 0x449   :  { %v615_v22 = vpop.permute.xlu1 %614 }
 0x44a   :  { %v617_v24 = vmul.f32 %v615_v22, %v612_v21 }
 0x44c   :  { %v623_v25 = vadd.f32 %v622_v23, %v617_v24 }
 0x44e   :  { %625 = vrot.lane.b32.xlu2 %v623_v25, %s1070_s0  ;;  %v630_v26 = vpack.c.bf16 %v623_v25, %v623_v25 }
 0x450   :  { %640 = vrot.lane.b32.xlu0 %v630_v26, %s1070_s0 }
 0x451   :  { %v495_v27 = vpop.permute.xlu1 %494 }
 0x452   :  { %497 = vst.msk [vmem:[#allocation8] sm:$0xff] %vm396_vm0, %v495_v27 }
 0x4a8   :  { %v626_v32 = vpop.permute.xlu2 %625 }
 0x4a9   :  { %629 = vst.msk [vmem:[#allocation8 + $0x8] sm:$0xff] %vm396_vm0, %v626_v32 }
 0x4aa   :  { %749 = dma.vmem_to_hbm [thread:$0]  %s742_s1, 256, %s744_s21, [#allocation9], %s1073_s9, %s1073_s9, %s1074_s22  }
 0x4c2   :  { %v641_v34 = vpop.permute.xlu0 %640 }
 0x4c3   :  { %920 = vmatmul.msk.bf16.vlgmr.msrb.gmra.mxu0 %vm396_vm0, %v641_v34 }
 0x540   :  { %v666_v37 = vpop.f32.mrf.mxu0 }
 0x541   :  { %v667_v38 = vadd.f32 %v972_v36, %v666_v37 }
 0x543   :  { %v670_v39 = vpack.c.bf16 %v667_v38, %v667_v38 }
 0x545   :  { %937 = vmatmul.msk.bf16.vlgmr.msrb.gmra.mxu1 %vm707_vm9, %v670_v39 }
 0x548   :  { %v668_v40 = vpop.f32.mrf.mxu0 }
 0x5c2   :  { %v720_v42 = vpop.f32.mrf.mxu1 }
 0x5c3   :  { %v721_v43 = vadd.f32 %v973_v41, %v720_v42 }
 0x5c5   :  { %v724_v44 = vpack.c.bf16 %v721_v43, %v721_v43 }
 0x5c7   :  { %725 = vst [vmem:[#allocation7] sm:$0xf] %v724_v44 }
 0x5c8   :  { %736 = dma.vmem_to_hbm [thread:$0]  %s732_s2, 64, %s734_s25, [#allocation5]  }
 0x5ca   :  { %v722_v45 = vpop.f32.mrf.mxu1 }
 0x5cb   :  { %1064 = dma.done.wait [#allocation5], 64  }
 0x5cc   :  { %1065 = vsyncadd [#allocation5], 4294967232 }
 0x5cd   :  { %1066 = dma.done.wait [#allocation9], 256  }
 0x5ce   :  { %1067 = vsyncadd [#allocation9], 4294967040 }
 0x5cf   :  { %758 = vsyncpa [#allocation5], 1 }
 0x5d0   :  { %759 = vsyncpa [#allocation9], 1 }
 0x5d1   :  { %760 = vsyncpa [#allocation6], 1 }
 0x5d2   :  { %761 = vsyncmov [#allocation3] }
 0x5d5   :  { %s762_s10 = vpop.sfrf %761 }
 0x5d6   :  { %p938_p0 = scmp.ne.s32.totalorder %s762_s10, 0 }
 0x5d8   :  { %766 = shalt.err (%p938_p0)  }
 0x5d9   :  { %768 = vsyncmov [#allocation3 + $0x1] }
 0x5dc   :  { %s769_s11 = vpop.sfrf %768 }
 0x5dd   :  { %p939_p1 = scmp.ne.s32.totalorder %s769_s11, 0 }
 0x5df   :  { %773 = shalt.err (%p939_p1)  }
 0x5e0   :  { %775 = vsyncmov [#allocation3 + $0x2] }
 0x5e3   :  { %s776_s12 = vpop.sfrf %775 }
 0x5e4   :  { %p940_p2 = scmp.ne.s32.totalorder %s776_s12, 0 }
 0x5e6   :  { %780 = shalt.err (%p940_p2)  }
 0x5e7   :  { %782 = vsyncmov [#allocation3 + $0x3] }
 0x5ea   :  { %s783_s5 = vpop.sfrf %782 }
 0x5eb   :  { %p941_p3 = scmp.ne.s32.totalorder %s783_s5, 0 }
 0x5ed   :  { %787 = shalt.err (%p941_p3)  }
 0x5ee   :  { %789 = vsyncmov [#allocation3 + $0x4] }
 0x5f1   :  { %s790_s6 = vpop.sfrf %789 }
 0x5f2   :  { %p942_p4 = scmp.ne.s32.totalorder %s790_s6, 0 }
 0x5f4   :  { %794 = shalt.err (%p942_p4)  }
 0x5f5   :  { %796 = vsyncmov [#allocation3 + $0x5] }
 0x5f8   :  { %s797_s26 = vpop.sfrf %796 }
 0x5f9   :  { %p943_p5 = scmp.ne.s32.totalorder %s797_s26, 0 }
 0x5fb   :  { %801 = shalt.err (%p943_p5)  }
 0x5fc   :  { %803 = vsyncmov [#allocation3 + $0x6] }
 0x5ff   :  { %s804_s27 = vpop.sfrf %803 }
 0x600   :  { %p944_p6 = scmp.ne.s32.totalorder %s804_s27, 0 }
 0x602   :  { %808 = shalt.err (%p944_p6)  }
 0x603   :  { %810 = vsyncmov [#allocation3 + $0x7] }
 0x606   :  { %s811_s28 = vpop.sfrf %810 }
 0x607   :  { %p945_p7 = scmp.ne.s32.totalorder %s811_s28, 0 }
 0x609   :  { %815 = shalt.err (%p945_p7)  }

</bundles_post_ra>
